<compile_context>
chip_gen: v5e
topology: v5e:2x2
jax: 0.10.0
libtpu: 0.0.40
codegen_flags: <defaults>
</compile_context>

<pallas_src>
import functools
from typing import NamedTuple

import numpy as np
import jax
import jax.numpy as jnp
from jax.experimental import pallas as pl
from jax.experimental.pallas import tpu as pltpu


def _round_up(x: int, m: int) -> int:
    return (x + m - 1) // m * m


# -----------------------------------------------------------------------------
# One-time weight preparation (cache this; reuse across all forward calls).
# -----------------------------------------------------------------------------
class ThetaPosteriorPacked(NamedTuple):
    w_pack: jax.Array   # (rows, lanes) packed [Wh.T ; Wc.T ; Wp.T ; biases]
    hid: int
    c_dim: int
    two_c: int
    off_wh: int
    off_wc: int
    off_wp: int
    off_b: int


def prepare_theta_posterior_params(params, weight_dtype=jnp.float32):
    """Pack PyTorch-layout (out, in) weights into one VMEM operand.

    Pre-transposes all three weight matrices and stacks them (plus the three
    biases) into a single 8-row-aligned 2D array so each forward call issues
    one weight DMA instead of five, with no per-call layout plumbing.
    """
    w_h = jnp.asarray(params["w_h"], jnp.float32)       # (hid, hid)
    b_h = jnp.asarray(params["b_h"], jnp.float32)       # (hid,)
    w_c = jnp.asarray(params["w_c"], jnp.float32)       # (hid, c_dim)
    b_c = jnp.asarray(params["b_c"], jnp.float32)       # (hid,)
    w_p = jnp.asarray(params["w_params"], jnp.float32)  # (2*c_dim, hid)
    b_p = jnp.asarray(params["b_params"], jnp.float32)  # (2*c_dim,)

    hid = w_h.shape[0]
    c_dim = w_c.shape[1]
    two_c = w_p.shape[0]
    lanes = max(hid, two_c)

    # Section row offsets, each aligned to the 8-sublane tile.
    off_wh = 0
    off_wc = off_wh + _round_up(hid, 8)
    off_wp = off_wc + _round_up(c_dim, 8)
    off_b = off_wp + _round_up(hid, 8)
    rows = off_b + 8                       # bias rows: b_h, b_c, b_params

    w_pack = jnp.zeros((rows, lanes), jnp.float32)
    w_pack = w_pack.at[off_wh:off_wh + hid, :hid].set(w_h.T)      # Wh.T
    w_pack = w_pack.at[off_wc:off_wc + c_dim, :hid].set(w_c.T)    # Wc.T
    w_pack = w_pack.at[off_wp:off_wp + hid, :two_c].set(w_p.T)    # Wp.T
    w_pack = w_pack.at[off_b, :hid].set(b_h)
    w_pack = w_pack.at[off_b + 1, :hid].set(b_c)
    w_pack = w_pack.at[off_b + 2, :two_c].set(b_p)
    # Only the weight *storage* dtype changes here; the kernel keeps the
    # bias-add / activation epilogue in f32 regardless (v5e has no bf16 VPU).
    w_pack = w_pack.astype(weight_dtype)

    return ThetaPosteriorPacked(
        w_pack=w_pack, hid=hid, c_dim=c_dim, two_c=two_c,
        off_wh=off_wh, off_wc=off_wc, off_wp=off_wp, off_b=off_b)


# -----------------------------------------------------------------------------
# Kernel
# -----------------------------------------------------------------------------
def _theta_posterior_kernel(*refs, hid, c_dim, two_c,
                            off_wh, off_wc, off_wp, off_b,
                            activation, has_c):
    if has_c:
        h_ref, c_ref, w_ref, out_ref = refs
    else:
        h_ref, w_ref, out_ref = refs
        c_ref = None

    w_is_bf16 = w_ref.dtype == jnp.bfloat16

    def mm(a, b):
        # Feed the MXU natively in bf16 when weights are stored bf16;
        # accumulation stays f32 either way.
        if w_is_bf16:
            a = a.astype(jnp.bfloat16)
        return jnp.dot(a, b, preferred_element_type=jnp.float32)

    h = h_ref[...].astype(jnp.float32)

    # th = h @ Wh.T + b_h
    w1 = w_ref[off_wh:off_wh + hid, :hid]
    b_h = w_ref[off_b:off_b + 1, :hid].astype(jnp.float32)
    t = mm(h, w1) + b_h

    if has_c:
        # tc = c @ Wc.T + b_c, broadcast over the row tile (expand_as).
        cv = c_ref[...].astype(jnp.float32)
        wc = w_ref[off_wc:off_wc + c_dim, :hid]
        b_c = w_ref[off_b + 1:off_b + 2, :hid].astype(jnp.float32)
        t = t + (mm(cv, wc) + b_c)

    t = activation(t)                       # f32 epilogue (VPU/EUP)

    # out = t @ Wp.T + b_params
    wp = w_ref[off_wp:off_wp + hid, :two_c]
    b_p = w_ref[off_b + 2:off_b + 3, :two_c].astype(jnp.float32)
    out = mm(t, wp) + b_p

    # Single contiguous, lane-dense store; mean/logvar split happens outside.
    out_ref[...] = out.astype(out_ref.dtype)


# -----------------------------------------------------------------------------
# Per-call wrapper
# -----------------------------------------------------------------------------
def theta_posterior_net(h, c, packed: ThetaPosteriorPacked,
                        activation=jax.nn.relu, *, max_rows_per_block=256):
    """Forward pass of ThetaPosteriorNet.

    Args:
      h: (N, hid_dim) conditional features.
      c: (1, c_dim) or (N, c_dim) context latent, or None.
      packed: result of prepare_theta_posterior_params (built once).
      activation: elementwise JAX callable.

    Returns:
      (mean, logvar), each (N, c_dim).
    """
    n, hid = h.shape
    if hid != packed.hid:
        raise ValueError(f"h has hid_dim={hid}, packed params expect {packed.hid}")
    c_dim, two_c = packed.c_dim, packed.two_c

    has_c = c is not None
    if has_c:
        c = jnp.asarray(c).reshape(-1, c_dim)
        if c.shape[0] not in (1, n):
            raise ValueError("c must have leading dim 1 or N (expand_as semantics)")

    # Row tiling: one block for small N; 256-row tiles on a parallel grid for
    # large / batched N (shards rows across both TensorCores on v7x).
    if n <= max_rows_per_block:
        tile_n, n_pad = n, n
    else:
        tile_n = max_rows_per_block
        n_pad = _round_up(n, tile_n)
    grid = (n_pad // tile_n,)

    h_in = h if n_pad == n else jnp.pad(h, ((0, n_pad - n), (0, 0)))

    in_specs = [pl.BlockSpec((tile_n, hid), lambda i: (i, 0))]
    args = [h_in]
    if has_c:
        if c.shape[0] == 1:
            in_specs.append(pl.BlockSpec((1, c_dim), lambda i: (0, 0)))
            args.append(c)
        else:
            c_in = c if n_pad == n else jnp.pad(c, ((0, n_pad - n), (0, 0)))
            in_specs.append(pl.BlockSpec((tile_n, c_dim), lambda i: (i, 0)))
            args.append(c_in)
    in_specs.append(pl.BlockSpec(packed.w_pack.shape, lambda i: (0, 0)))
    args.append(packed.w_pack)

    out_specs = pl.BlockSpec((tile_n, two_c), lambda i: (i, 0))

    # Honest scheduler hint for this overhead-dominated call.
    flops = 2 * n_pad * hid * hid + 2 * n_pad * hid * two_c
    if has_c:
        flops += 2 * c.shape[0] * c_dim * hid
    transcendentals = 0 if activation is jax.nn.relu else n_pad * hid
    bytes_accessed = (sum(int(a.size) * a.dtype.itemsize for a in args)
                      + n_pad * two_c * h.dtype.itemsize)
    cost = pl.CostEstimate(flops=flops, transcendentals=transcendentals,
                           bytes_accessed=bytes_accessed)

    kernel = functools.partial(
        _theta_posterior_kernel,
        hid=hid, c_dim=c_dim, two_c=two_c,
        off_wh=packed.off_wh, off_wc=packed.off_wc,
        off_wp=packed.off_wp, off_b=packed.off_b,
        activation=activation, has_c=has_c)

    out = pl.pallas_call(
        kernel,
        out_shape=jax.ShapeDtypeStruct((n_pad, two_c), h.dtype),
        grid=grid,
        in_specs=in_specs,
        out_specs=out_specs,
        compiler_params=pltpu.CompilerParams(
            dimension_semantics=("parallel",),
            vmem_limit_bytes=32 * 1024 * 1024),
        cost_estimate=cost,
    )(*args)

    out = out[:n]
    # torch.chunk(out, 2, dim=-1) done outside the kernel (plain lane slice).
    return out[:, :c_dim], out[:, c_dim:]


# -----------------------------------------------------------------------------
# Test harness
# -----------------------------------------------------------------------------
def _init_params(key, hid_dim, c_dim):
    """Deterministic synthetic init, PyTorch nn.Linear layout (out, in)."""
    ks = jax.random.split(key, 6)

    def u(k, shape, fan_in):
        s = 1.0 / np.sqrt(fan_in)
        return jax.random.uniform(k, shape, jnp.float32, -s, s)

    return {
        "w_h": u(ks[0], (hid_dim, hid_dim), hid_dim),
        "b_h": u(ks[1], (hid_dim,), hid_dim),
        "w_c": u(ks[2], (hid_dim, c_dim), c_dim),
        "b_c": u(ks[3], (hid_dim,), c_dim),
        "w_params": u(ks[4], (2 * c_dim, hid_dim), hid_dim),
        "b_params": u(ks[5], (2 * c_dim,), hid_dim),
    }


def _reference_np(h, c, p, activation_np):
    """Float64 numpy mirror of the PyTorch forward, for validation."""
    h64 = np.asarray(h, np.float64)
    th = h64 @ np.asarray(p["w_h"], np.float64).T + np.asarray(p["b_h"], np.float64)
    if c is not None:
        c64 = np.asarray(c, np.float64).reshape(-1, p["w_c"].shape[1])
        tc = c64 @ np.asarray(p["w_c"], np.float64).T + np.asarray(p["b_c"], np.float64)
        tc = np.broadcast_to(tc, th.shape)
    else:
        tc = np.zeros_like(th)
    t = activation_np(th + tc)
    out = t @ np.asarray(p["w_params"], np.float64).T + np.asarray(p["b_params"], np.float64)
    cd = p["w_params"].shape[0] // 2
    return out[:, :cd], out[:, cd:]


if __name__ == "__main__":
    HID_DIM, C_DIM = 32, 16
    activation = jax.nn.relu
    act_np = lambda x: np.maximum(x, 0.0)

    key = jax.random.PRNGKey(0)
    k_p, k_data = jax.random.split(key)
    params = _init_params(k_p, HID_DIM, C_DIM)

    # Weight layout built ONCE, reused by every forward call.
    packed = prepare_theta_posterior_params(params)

    cases = [
        (8, "broadcast"),    # N=8, c is (1, c_dim)   -> single block
        (8, "none"),         # c is None              -> tc = 0 path
        (8, "per_row"),      # c is (N, c_dim)        -> expand_as is a no-op
        (300, "broadcast"),  # N=300 -> 256-row tiles, padded to 512, parallel grid
    ]
    for idx, (n, mode) in enumerate(cases):
        kh, kc = jax.random.split(jax.random.fold_in(k_data, idx))
        h = jax.random.normal(kh, (n, HID_DIM), jnp.float32)
        if mode == "broadcast":
            c = jax.random.normal(kc, (1, C_DIM), jnp.float32)
        elif mode == "per_row":
            c = jax.random.normal(kc, (n, C_DIM), jnp.float32)
        else:
            c = None

        mean, logvar = theta_posterior_net(h, c, packed, activation)
        jax.block_until_ready((mean, logvar))

        ref_mean, ref_logvar = _reference_np(h, c, params, act_np)
        # Reference is float64; tolerance covers MXU f32 rounding of the fused path.
        np.testing.assert_allclose(np.asarray(mean), ref_mean, rtol=5e-3, atol=5e-3)
        np.testing.assert_allclose(np.asarray(logvar), ref_logvar, rtol=5e-3, atol=5e-3)

    print("KERNEL_OK")
</pallas_src>

<mosaic_0001>
module attributes {stable_mosaic.version = 11 : i64} {
  func.func @_theta_posterior_kernel(%arg0: i32, %arg1: memref<8x32xf32, #tpu.memory_space<vmem>>, %arg2: memref<1x16xf32, #tpu.memory_space<vmem>>, %arg3: memref<88x32xf32, #tpu.memory_space<vmem>>, %arg4: memref<8x32xf32, #tpu.memory_space<vmem>>) attributes {dimension_semantics = [#tpu.dimension_semantics<parallel>], iteration_bounds = array<i64: 1>, scalar_prefetch = 0 : i64, scratch_operands = 0 : i64, tpu.core_type = #tpu.core_type<tc>, window_params = [{transform_indices = @transform_0, window_bounds = array<i64: 8, 32>}, {pipeline_mode = #tpu.pipeline_mode<synchronous>, transform_indices = @transform_1, window_bounds = array<i64: 1, 16>}, {pipeline_mode = #tpu.pipeline_mode<synchronous>, transform_indices = @transform_2, window_bounds = array<i64: 88, 32>}, {transform_indices = @transform_3, window_bounds = array<i64: 8, 32>}]} {
    %c0 = arith.constant 0 : index
    %c0_0 = arith.constant 0 : index
    %0 = vector.load %arg1[%c0, %c0_0] : memref<8x32xf32, #tpu.memory_space<vmem>>, vector<8x32xf32>
    %c0_1 = arith.constant 0 : index
    %c0_2 = arith.constant 0 : index
    %1 = vector.load %arg3[%c0_1, %c0_2] : memref<88x32xf32, #tpu.memory_space<vmem>>, vector<32x32xf32>
    %c80 = arith.constant 80 : index
    %c0_3 = arith.constant 0 : index
    %2 = vector.load %arg3[%c80, %c0_3] : memref<88x32xf32, #tpu.memory_space<vmem>>, vector<1x32xf32>
    %cst = arith.constant dense<0.000000e+00> : vector<8x32xf32>
    %3 = tpu.matmul %0, %1, %cst {dimension_numbers = #tpu.dot_dimension_numbers<[1], [0], [0], [1], [0, 0, 1, 1], [], []>} : vector<8x32xf32>, vector<32x32xf32>, vector<8x32xf32> -> vector<8x32xf32>
    %4 = vector.broadcast %2 : vector<1x32xf32> to vector<8x32xf32>
    %5 = arith.addf %3, %4 : vector<8x32xf32>
    %c0_4 = arith.constant 0 : index
    %c0_5 = arith.constant 0 : index
    %6 = vector.load %arg2[%c0_4, %c0_5] : memref<1x16xf32, #tpu.memory_space<vmem>>, vector<1x16xf32>
    %c32 = arith.constant 32 : index
    %c0_6 = arith.constant 0 : index
    %7 = vector.load %arg3[%c32, %c0_6] : memref<88x32xf32, #tpu.memory_space<vmem>>, vector<16x32xf32>
    %c81 = arith.constant 81 : index
    %c0_7 = arith.constant 0 : index
    %8 = vector.load %arg3[%c81, %c0_7] : memref<88x32xf32, #tpu.memory_space<vmem>>, vector<1x32xf32>
    %cst_8 = arith.constant dense<0.000000e+00> : vector<1x32xf32>
    %9 = tpu.matmul %6, %7, %cst_8 {dimension_numbers = #tpu.dot_dimension_numbers<[1], [0], [0], [1], [0, 0, 1, 1], [], []>} : vector<1x16xf32>, vector<16x32xf32>, vector<1x32xf32> -> vector<1x32xf32>
    %10 = arith.addf %9, %8 : vector<1x32xf32>
    %11 = vector.broadcast %10 : vector<1x32xf32> to vector<8x32xf32>
    %12 = arith.addf %5, %11 : vector<8x32xf32>
    %cst_9 = arith.constant 0.000000e+00 : f32
    %13 = vector.broadcast %cst_9 : f32 to vector<8x32xf32>
    %14 = arith.maximumf %12, %13 : vector<8x32xf32>
    %c48 = arith.constant 48 : index
    %c0_10 = arith.constant 0 : index
    %15 = vector.load %arg3[%c48, %c0_10] : memref<88x32xf32, #tpu.memory_space<vmem>>, vector<32x32xf32>
    %c82 = arith.constant 82 : index
    %c0_11 = arith.constant 0 : index
    %16 = vector.load %arg3[%c82, %c0_11] : memref<88x32xf32, #tpu.memory_space<vmem>>, vector<1x32xf32>
    %cst_12 = arith.constant dense<0.000000e+00> : vector<8x32xf32>
    %17 = tpu.matmul %14, %15, %cst_12 {dimension_numbers = #tpu.dot_dimension_numbers<[1], [0], [0], [1], [0, 0, 1, 1], [], []>} : vector<8x32xf32>, vector<32x32xf32>, vector<8x32xf32> -> vector<8x32xf32>
    %18 = vector.broadcast %16 : vector<1x32xf32> to vector<8x32xf32>
    %19 = arith.addf %17, %18 : vector<8x32xf32>
    %c0_13 = arith.constant 0 : index
    %c0_14 = arith.constant 0 : index
    %20 = vector.load %arg4[%c0_13, %c0_14] : memref<8x32xf32, #tpu.memory_space<vmem>>, vector<8x32xf32>
    tpu.vector_store %arg4[%c0_13, %c0_14], %19 {strides = array<i32>} : memref<8x32xf32, #tpu.memory_space<vmem>>, vector<8x32xf32>,
    return
  }
  func.func @transform_0(%arg0: i32) -> (i32, i32) {
    %c0_i32 = arith.constant 0 : i32
    %c0_i32_0 = arith.constant 0 : i32
    return %arg0, %c0_i32 : i32, i32
  }
  func.func @transform_1(%arg0: i32) -> (i32, i32) {
    %c0_i32 = arith.constant 0 : i32
    %c0_i32_0 = arith.constant 0 : i32
    %c0_i32_1 = arith.constant 0 : i32
    return %c0_i32, %c0_i32_0 : i32, i32
  }
  func.func @transform_2(%arg0: i32) -> (i32, i32) {
    %c0_i32 = arith.constant 0 : i32
    %c0_i32_0 = arith.constant 0 : i32
    %c0_i32_1 = arith.constant 0 : i32
    return %c0_i32, %c0_i32_0 : i32, i32
  }
  func.func @transform_3(%arg0: i32) -> (i32, i32) {
    %c0_i32 = arith.constant 0 : i32
    %c0_i32_0 = arith.constant 0 : i32
    return %arg0, %c0_i32 : i32, i32
  }
}

</mosaic_0001>

<bundles_post_ra>
// kernel: tpu_custom_call.1
= control target key start
LH: loop header
LB: loop body
LE: loop exit
PB: predicated region body
PF: predicated region fallthrough
CT: control target
= control target key end

     0   :  { %vm50_vm0 = vcmask 130048   ;;  %s227_s0 = inlined_call_operand.vmem [shape: f32[8,32], index: 0, kind: input, shape index: {}]   ;;  %s228_s1 = inlined_call_operand.vmem [shape: f32[1,16], index: 1, kind: input, shape index: {}]   ;;  %s229_s2 = inlined_call_operand.vmem [shape: f32[88,32], index: 2, kind: input, shape index: {}]   ;;  %s230_s3 = inlined_call_operand.hbm [shape: f32[8,32], index: 3, kind: output, shape index: {}]  }
   0x1   :  { %v19_v0 = vld [vmem:[%s229_s2 + $0x18] sm:$0xff]  ;;  %v18_v1 = vld [vmem:[%s229_s2 + $0x10] sm:$0xff]  ;;  %v48_v2 = vld [vmem:[%s229_s2 + $0x28] sm:$0xff] }
   0x2   :  { %38 = vmatpush.msra.mxu0 %v19_v0  ;;  %68 = vmatpush.msra.mxu1 %v48_v2  ;;  %v47_v3 = vld [vmem:[%s229_s2 + $0x20] sm:$0xff]  ;;  %v17_v5 = vld [vmem:[%s229_s2 + $0x8] sm:$0xff] }
   0x3   :  { %v46_v4 = vld [vmem:[%s228_s1] sm:$0x1] }
   0x4   :  { %39 = vmatpush.msra.mxu0 %v18_v1  ;;  %69 = vmatpush.msra.mxu1 %v47_v3 }
   0x5   :  { %8 = vsyncpa [#allocation3], 0  ;;  %124 = vmatmul.msk.f32.vlgmr.msra.gmra.mxu1 %vm50_vm0, %v46_v4  ;;  %v16_v6 = vld [vmem:[%s229_s2] sm:$0xff]  ;;  %vm22_vm1 = vcmask 261120   ;;  %v80_v8 = vld [vmem:[%s229_s2 + $0x48] sm:$0xff]  ;;  %s155_s13 = smov [#allocation2]  }
   0x6   :  { %40 = vmatpush.msra.mxu0 %v17_v5  ;;  %v15_v7 = vld [vmem:[%s227_s0] sm:$0xff]  ;;  %98 = vmatpush.msra.mxu2 %v80_v8  ;;  %v78_v10 = vld [vmem:[%s229_s2 + $0x38] sm:$0xff]  ;;  %v77_v11 = vld [vmem:[%s229_s2 + $0x30] sm:$0xff]  ;;  %s112_s14 = sshll.u32 %s155_s13, 4  ;;  %s114_s17 = sshll.u32 %s230_s3, 4  ;;  %s113_s14 = int_to_ptr.vmem [resolvable:$true] %s112_s14  ;;  %s115_s17 = int_to_ptr.hbm [resolvable:$true] %s114_s17 }
   0x7   :  { %v79_v9 = vld [vmem:[%s229_s2 + $0x40] sm:$0xff]  ;;  %v49_v12 = vld [vmem:[%s229_s2 + $0x51] sm:$0x1]  ;;  %v127_v15 = vld [vmem:[%s229_s2 + $0x50] ss:$0 sm:$0xff] }
   0x8   :  { %41 = vmatpush.msra.mxu0 %v16_v6  ;;  %99 = vmatpush.msra.mxu2 %v79_v9  ;;  %v128_v21 = vld [vmem:[%s229_s2 + $0x52] ss:$0 sm:$0xff] }
   0x9   :  { %123 = vmatmul.msk.f32.vlgmr.msra.gmra.mxu0 %vm22_vm1, %v15_v7 }
   0xa   :  { %100 = vmatpush.msra.mxu2 %v78_v10 }
   0xc   :  { %101 = vmatpush.msra.mxu2 %v77_v11 }
  0x82   :  { %v71_v13 = vpop.f32.mrf.mxu1 }
  0x83   :  { %v72_v14 = vadd.f32 %v71_v13, %v49_v12 }
  0x85   :  { %v74_v16 = vperm.slane %v72_v14, 0 }
  0x86   :  { %v43_v17 = vpop.f32.mrf.mxu0 }
  0x87   :  { %v44_v18 = vadd.f32 %v127_v15, %v43_v17 }
  0x89   :  { %v75_v19 = vadd.f32 %v74_v16, %v44_v18 }
  0x8b   :  { %v76_v20 = vmax.f32 %v75_v19, 0.0 }
  0x8d   :  { %125 = vmatmul.msk.f32.vlgmr.msra.gmra.mxu2 %vm22_vm1, %v76_v20 }
 0x110   :  { %v103_v22 = vpop.f32.mrf.mxu2 }
 0x111   :  { %v104_v23 = vadd.f32 %v128_v21, %v103_v22 }
 0x113   :  { %106 = vst.msk [vmem:[#allocation2] sm:$0xff] %vm22_vm1, %v104_v23 }
 0x114   :  { %117 = dma.vmem_to_hbm [thread:$0]  %s113_s14, 128, %s115_s17, [#allocation3]  }
 0x115   :  { %153 = dma.done.wait [#allocation3], 128  }
 0x116   :  { %154 = vsyncadd [#allocation3], 4294967168 }
 0x117   :  { %122 = vsyncpa [#allocation3], 1 }

</bundles_post_ra>
